<compile_context>
chip_gen: v6e
topology: v6e:2x2x1
jax: 0.10.0
libtpu: 0.0.40
codegen_flags: <defaults>
</compile_context>

<pallas_src>
import functools

import jax
import jax.numpy as jnp
from jax.experimental import pallas as pl
from jax.experimental.pallas import tpu as pltpu


LN_EPS = 1e-5    # PyTorch nn.LayerNorm default
LANE = 128
TILE_B = 1024    # large tiles amortize per-step pipeline overhead; VMEM use
                 # stays ~1-3 MB/step, far under every generation's limit.


def _round_up(x, m):
    return ((x + m - 1) // m) * m


def _layer_norm_onepass(h, gamma, beta):
    """PyTorch LayerNorm (biased variance), one-pass stats, clamped variance."""
    n = h.shape[-1]
    inv_n = 1.0 / float(n)
    s = jnp.sum(h, axis=-1, keepdims=True)
    ss = jnp.sum(h * h, axis=-1, keepdims=True)
    mean = s * inv_n
    var = jnp.maximum(ss * inv_n - mean * mean, 0.0)
    hn = (h - mean) * jax.lax.rsqrt(var + LN_EPS)
    return hn * gamma + beta


def actor_kernel(x_ref,
                 w1_ref, b1_ref, g1_ref, be1_ref,
                 w2_ref, b2_ref, g2_ref, be2_ref,
                 w3_ref, b3_ref,
                 out_ref):
    # MXU matmuls in bf16 with f32 accumulation; VPU math (LN/ReLU/tanh) in f32.
    x = x_ref[...].astype(jnp.bfloat16)

    # linear1 + ln1 + relu
    h = jnp.dot(x, w1_ref[...], preferred_element_type=jnp.float32) + b1_ref[...]
    h = _layer_norm_onepass(h, g1_ref[...], be1_ref[...])
    h = jnp.maximum(h, 0.0)

    # linear2 + ln2 + relu
    h = jnp.dot(h.astype(jnp.bfloat16), w2_ref[...],
                preferred_element_type=jnp.float32) + b2_ref[...]
    h = _layer_norm_onepass(h, g2_ref[...], be2_ref[...])
    h = jnp.maximum(h, 0.0)

    # mu head (lane-padded to 128) + tanh; full-lane store
    mu = jnp.dot(h.astype(jnp.bfloat16), w3_ref[...],
                 preferred_element_type=jnp.float32) + b3_ref[...]
    out_ref[...] = jnp.tanh(mu)


def prepare_params(params, num_outputs):
    """One-time param prep: bf16 matmul weights + lane-padded (128) mu head."""
    h2 = params["w3"].shape[0]
    out_pad = _round_up(max(num_outputs, LANE), LANE)
    w3p = jnp.zeros((h2, out_pad), jnp.float32).at[:, :num_outputs].set(params["w3"])
    b3p = jnp.zeros((1, out_pad), jnp.float32).at[:, :num_outputs].set(params["b3"])
    return {
        "w1": params["w1"].astype(jnp.bfloat16),
        "b1": params["b1"],
        "g1": params["g1"], "be1": params["be1"],
        "w2": params["w2"].astype(jnp.bfloat16),
        "b2": params["b2"],
        "g2": params["g2"], "be2": params["be2"],
        "w3": w3p.astype(jnp.bfloat16),
        "b3": b3p,
    }


@functools.partial(jax.jit, static_argnames=("num_outputs", "tile_b"))
def actor_forward(x, prepared, *, num_outputs, tile_b=TILE_B):
    """Run the Actor MLP forward pass as a batch-tiled Pallas kernel."""
    batch, num_inputs = x.shape
    out_pad = prepared["w3"].shape[1]

    # --- batch tiling.  Tile is a multiple of 8 (f32 sublane) and is capped at
    #     ceil(batch/2) so batches >= 16 always produce >= 2 grid steps (the
    #     "parallel" axis then feeds both v7x TensorCores; no-op on v5e/v6e).
    tb = min(tile_b, _round_up(pl.cdiv(batch, 2), 8))
    b_pad = _round_up(batch, tb)
    if b_pad != batch:
        # Padded rows flow through bias->LN->tanh (nonzero garbage) and are
        # sliced off below; they are never part of the returned result.
        x = jnp.pad(x, ((0, b_pad - batch), (0, 0)))
    grid = (b_pad // tb,)

    def tile_spec(shape):
        # x / out: advance one tile of rows per grid step
        return pl.BlockSpec(shape, lambda i: (i, 0))

    def resident_spec(arr):
        # weights / biases / LN affine: same block every step -> stay in VMEM
        return pl.BlockSpec(arr.shape, lambda i: (0, 0))

    args = (
        x,
        prepared["w1"], prepared["b1"], prepared["g1"], prepared["be1"],
        prepared["w2"], prepared["b2"], prepared["g2"], prepared["be2"],
        prepared["w3"], prepared["b3"],
    )
    in_specs = [tile_spec((tb, num_inputs))] + [resident_spec(a) for a in args[1:]]

    out = pl.pallas_call(
        actor_kernel,
        out_shape=jax.ShapeDtypeStruct((b_pad, out_pad), jnp.float32),
        grid=grid,
        in_specs=in_specs,
        out_specs=tile_spec((tb, out_pad)),
        compiler_params=pltpu.CompilerParams(
            dimension_semantics=("parallel",),  # v7x: shard batch tiles over 2 TCs
        ),
    )(*args)

    return out[:batch, :num_outputs]


def init_params(key, num_inputs, hidden_size, num_outputs):
    """Deterministic f32 parameter init matching the PyTorch module's shapes."""
    h2 = hidden_size // 2
    ks = jax.random.split(key, 6)

    def linear_init(kw, kb, fan_in, fan_out):
        # PyTorch nn.Linear default: U(-1/sqrt(fan_in), 1/sqrt(fan_in))
        bound = 1.0 / jnp.sqrt(fan_in)
        w = jax.random.uniform(kw, (fan_in, fan_out), jnp.float32, -bound, bound)
        b = jax.random.uniform(kb, (1, fan_out), jnp.float32, -bound, bound)
        return w, b

    w1, b1 = linear_init(ks[0], ks[1], num_inputs, hidden_size)
    w2, b2 = linear_init(ks[2], ks[3], hidden_size, h2)
    w3, b3 = linear_init(ks[4], ks[5], h2, num_outputs)
    # self.mu.weight.data.mul_(0.1); self.mu.bias.data.mul_(0.1)
    w3 = w3 * 0.1
    b3 = b3 * 0.1

    return {
        "w1": w1, "b1": b1,
        "g1": jnp.ones((1, hidden_size), jnp.float32),
        "be1": jnp.zeros((1, hidden_size), jnp.float32),
        "w2": w2, "b2": b2,
        "g2": jnp.ones((1, h2), jnp.float32),
        "be2": jnp.zeros((1, h2), jnp.float32),
        "w3": w3, "b3": b3,
    }


def _layer_norm_ref(h, gamma, beta):
    mean = jnp.mean(h, axis=-1, keepdims=True)
    var = jnp.mean((h - mean) ** 2, axis=-1, keepdims=True)
    return (h - mean) * jax.lax.rsqrt(var + LN_EPS) * gamma + beta


def actor_reference(x, p):
    """Pure-JAX f32 reference (PyTorch-semantics two-pass LayerNorm)."""
    h = x @ p["w1"] + p["b1"]
    h = jnp.maximum(_layer_norm_ref(h, p["g1"], p["be1"]), 0.0)
    h = h @ p["w2"] + p["b2"]
    h = jnp.maximum(_layer_norm_ref(h, p["g2"], p["be2"]), 0.0)
    return jnp.tanh(h @ p["w3"] + p["b3"])


if __name__ == "__main__":
    # Small, module-consistent shapes:
    #   num_inputs = (32,)  -> linear1 in-features = 32
    #   hidden_size = 64    -> linear2: 64 -> 32
    #   action_space.shape = (5,) -> num_outputs = 5 - 1 = 4
    batch = 8
    num_inputs = 32
    hidden_size = 64
    num_outputs = 4

    key = jax.random.PRNGKey(0)
    k_x, k_p = jax.random.split(key)
    x = jax.random.normal(k_x, (batch, num_inputs), jnp.float32)
    params = init_params(k_p, num_inputs, hidden_size, num_outputs)
    prepared = prepare_params(params, num_outputs)

    mu = actor_forward(x, prepared, num_outputs=num_outputs)
    mu = jax.block_until_ready(mu)

    ref = actor_reference(x, params)
    assert mu.shape == (batch, num_outputs)
    # bf16 matmul inputs -> relaxed tolerance vs the f32 reference.
    assert jnp.allclose(mu, ref, atol=2e-2, rtol=2e-2), "mismatch vs reference"

    print("KERNEL_OK")
</pallas_src>

<mosaic_0001>
module attributes {stable_mosaic.version = 11 : i64} {
  func.func @actor_kernel(%arg0: i32, %arg1: memref<8x32xf32, #tpu.memory_space<vmem>>, %arg2: memref<32x64xbf16, #tpu.memory_space<vmem>>, %arg3: memref<1x64xf32, #tpu.memory_space<vmem>>, %arg4: memref<1x64xf32, #tpu.memory_space<vmem>>, %arg5: memref<1x64xf32, #tpu.memory_space<vmem>>, %arg6: memref<64x32xbf16, #tpu.memory_space<vmem>>, %arg7: memref<1x32xf32, #tpu.memory_space<vmem>>, %arg8: memref<1x32xf32, #tpu.memory_space<vmem>>, %arg9: memref<1x32xf32, #tpu.memory_space<vmem>>, %arg10: memref<32x128xbf16, #tpu.memory_space<vmem>>, %arg11: memref<1x128xf32, #tpu.memory_space<vmem>>, %arg12: memref<8x128xf32, #tpu.memory_space<vmem>>) attributes {dimension_semantics = [#tpu.dimension_semantics<parallel>], iteration_bounds = array<i64: 1>, scalar_prefetch = 0 : i64, scratch_operands = 0 : i64, tpu.core_type = #tpu.core_type<tc>, window_params = [{transform_indices = @transform_0, window_bounds = array<i64: 8, 32>}, {pipeline_mode = #tpu.pipeline_mode<synchronous>, transform_indices = @transform_1, window_bounds = array<i64: 32, 64>}, {pipeline_mode = #tpu.pipeline_mode<synchronous>, transform_indices = @transform_2, window_bounds = array<i64: 1, 64>}, {pipeline_mode = #tpu.pipeline_mode<synchronous>, transform_indices = @transform_3, window_bounds = array<i64: 1, 64>}, {pipeline_mode = #tpu.pipeline_mode<synchronous>, transform_indices = @transform_4, window_bounds = array<i64: 1, 64>}, {pipeline_mode = #tpu.pipeline_mode<synchronous>, transform_indices = @transform_5, window_bounds = array<i64: 64, 32>}, {pipeline_mode = #tpu.pipeline_mode<synchronous>, transform_indices = @transform_6, window_bounds = array<i64: 1, 32>}, {pipeline_mode = #tpu.pipeline_mode<synchronous>, transform_indices = @transform_7, window_bounds = array<i64: 1, 32>}, {pipeline_mode = #tpu.pipeline_mode<synchronous>, transform_indices = @transform_8, window_bounds = array<i64: 1, 32>}, {pipeline_mode = #tpu.pipeline_mode<synchronous>, transform_indices = @transform_9, window_bounds = array<i64: 32, 128>}, {pipeline_mode = #tpu.pipeline_mode<synchronous>, transform_indices = @transform_10, window_bounds = array<i64: 1, 128>}, {transform_indices = @transform_11, window_bounds = array<i64: 8, 128>}]} {
    %c0 = arith.constant 0 : index
    %c0_0 = arith.constant 0 : index
    %0 = vector.load %arg1[%c0, %c0_0] : memref<8x32xf32, #tpu.memory_space<vmem>>, vector<8x32xf32>
    %1 = arith.truncf %0 : vector<8x32xf32> to vector<8x32xbf16>
    %c0_1 = arith.constant 0 : index
    %c0_2 = arith.constant 0 : index
    %2 = vector.load %arg2[%c0_1, %c0_2] : memref<32x64xbf16, #tpu.memory_space<vmem>>, vector<32x64xbf16>
    %cst = arith.constant dense<0.000000e+00> : vector<8x64xf32>
    %3 = tpu.matmul %1, %2, %cst {dimension_numbers = #tpu.dot_dimension_numbers<[1], [0], [0], [1], [0, 0, 1, 1], [], []>} : vector<8x32xbf16>, vector<32x64xbf16>, vector<8x64xf32> -> vector<8x64xf32>
    %c0_3 = arith.constant 0 : index
    %c0_4 = arith.constant 0 : index
    %4 = vector.load %arg3[%c0_3, %c0_4] : memref<1x64xf32, #tpu.memory_space<vmem>>, vector<1x64xf32>
    %5 = vector.broadcast %4 : vector<1x64xf32> to vector<8x64xf32>
    %6 = arith.addf %3, %5 : vector<8x64xf32>
    %c0_5 = arith.constant 0 : index
    %c0_6 = arith.constant 0 : index
    %7 = vector.load %arg4[%c0_5, %c0_6] : memref<1x64xf32, #tpu.memory_space<vmem>>, vector<1x64xf32>
    %c0_7 = arith.constant 0 : index
    %c0_8 = arith.constant 0 : index
    %8 = vector.load %arg5[%c0_7, %c0_8] : memref<1x64xf32, #tpu.memory_space<vmem>>, vector<1x64xf32>
    %cst_9 = arith.constant dense<0.000000e+00> : vector<8xf32>
    %9 = vector.multi_reduction <add>, %6, %cst_9 [1] : vector<8x64xf32> to vector<8xf32>
    %10 = vector.shape_cast %9 : vector<8xf32> to vector<8x1xf32>
    %11 = arith.mulf %6, %6 : vector<8x64xf32>
    %cst_10 = arith.constant dense<0.000000e+00> : vector<8xf32>
    %12 = vector.multi_reduction <add>, %11, %cst_10 [1] : vector<8x64xf32> to vector<8xf32>
    %13 = vector.shape_cast %12 : vector<8xf32> to vector<8x1xf32>
    %cst_11 = arith.constant 1.562500e-02 : f32
    %14 = vector.broadcast %cst_11 : f32 to vector<8x1xf32>
    %15 = arith.mulf %10, %14 : vector<8x1xf32>
    %cst_12 = arith.constant 1.562500e-02 : f32
    %16 = vector.broadcast %cst_12 : f32 to vector<8x1xf32>
    %17 = arith.mulf %13, %16 : vector<8x1xf32>
    %18 = arith.mulf %15, %15 : vector<8x1xf32>
    %19 = arith.subf %17, %18 : vector<8x1xf32>
    %cst_13 = arith.constant 0.000000e+00 : f32
    %20 = vector.broadcast %cst_13 : f32 to vector<8x1xf32>
    %21 = arith.maximumf %19, %20 : vector<8x1xf32>
    %22 = vector.broadcast %15 : vector<8x1xf32> to vector<8x64xf32>
    %23 = arith.subf %6, %22 : vector<8x64xf32>
    %cst_14 = arith.constant 9.99999974E-6 : f32
    %24 = vector.broadcast %cst_14 : f32 to vector<8x1xf32>
    %25 = arith.addf %21, %24 : vector<8x1xf32>
    %26 = math.rsqrt %25 : vector<8x1xf32>
    %27 = vector.broadcast %26 : vector<8x1xf32> to vector<8x64xf32>
    %28 = arith.mulf %23, %27 : vector<8x64xf32>
    %29 = vector.broadcast %7 : vector<1x64xf32> to vector<8x64xf32>
    %30 = arith.mulf %28, %29 : vector<8x64xf32>
    %31 = vector.broadcast %8 : vector<1x64xf32> to vector<8x64xf32>
    %32 = arith.addf %30, %31 : vector<8x64xf32>
    %cst_15 = arith.constant 0.000000e+00 : f32
    %33 = vector.broadcast %cst_15 : f32 to vector<8x64xf32>
    %34 = arith.maximumf %32, %33 : vector<8x64xf32>
    %35 = arith.truncf %34 : vector<8x64xf32> to vector<8x64xbf16>
    %c0_16 = arith.constant 0 : index
    %c0_17 = arith.constant 0 : index
    %36 = vector.load %arg6[%c0_16, %c0_17] : memref<64x32xbf16, #tpu.memory_space<vmem>>, vector<64x32xbf16>
    %cst_18 = arith.constant dense<0.000000e+00> : vector<8x32xf32>
    %37 = tpu.matmul %35, %36, %cst_18 {dimension_numbers = #tpu.dot_dimension_numbers<[1], [0], [0], [1], [0, 0, 1, 1], [], []>} : vector<8x64xbf16>, vector<64x32xbf16>, vector<8x32xf32> -> vector<8x32xf32>
    %c0_19 = arith.constant 0 : index
    %c0_20 = arith.constant 0 : index
    %38 = vector.load %arg7[%c0_19, %c0_20] : memref<1x32xf32, #tpu.memory_space<vmem>>, vector<1x32xf32>
    %39 = vector.broadcast %38 : vector<1x32xf32> to vector<8x32xf32>
    %40 = arith.addf %37, %39 : vector<8x32xf32>
    %c0_21 = arith.constant 0 : index
    %c0_22 = arith.constant 0 : index
    %41 = vector.load %arg8[%c0_21, %c0_22] : memref<1x32xf32, #tpu.memory_space<vmem>>, vector<1x32xf32>
    %c0_23 = arith.constant 0 : index
    %c0_24 = arith.constant 0 : index
    %42 = vector.load %arg9[%c0_23, %c0_24] : memref<1x32xf32, #tpu.memory_space<vmem>>, vector<1x32xf32>
    %cst_25 = arith.constant dense<0.000000e+00> : vector<8xf32>
    %43 = vector.multi_reduction <add>, %40, %cst_25 [1] : vector<8x32xf32> to vector<8xf32>
    %44 = vector.shape_cast %43 : vector<8xf32> to vector<8x1xf32>
    %45 = arith.mulf %40, %40 : vector<8x32xf32>
    %cst_26 = arith.constant dense<0.000000e+00> : vector<8xf32>
    %46 = vector.multi_reduction <add>, %45, %cst_26 [1] : vector<8x32xf32> to vector<8xf32>
    %47 = vector.shape_cast %46 : vector<8xf32> to vector<8x1xf32>
    %cst_27 = arith.constant 3.125000e-02 : f32
    %48 = vector.broadcast %cst_27 : f32 to vector<8x1xf32>
    %49 = arith.mulf %44, %48 : vector<8x1xf32>
    %cst_28 = arith.constant 3.125000e-02 : f32
    %50 = vector.broadcast %cst_28 : f32 to vector<8x1xf32>
    %51 = arith.mulf %47, %50 : vector<8x1xf32>
    %52 = arith.mulf %49, %49 : vector<8x1xf32>
    %53 = arith.subf %51, %52 : vector<8x1xf32>
    %cst_29 = arith.constant 0.000000e+00 : f32
    %54 = vector.broadcast %cst_29 : f32 to vector<8x1xf32>
    %55 = arith.maximumf %53, %54 : vector<8x1xf32>
    %56 = vector.broadcast %49 : vector<8x1xf32> to vector<8x32xf32>
    %57 = arith.subf %40, %56 : vector<8x32xf32>
    %cst_30 = arith.constant 9.99999974E-6 : f32
    %58 = vector.broadcast %cst_30 : f32 to vector<8x1xf32>
    %59 = arith.addf %55, %58 : vector<8x1xf32>
    %60 = math.rsqrt %59 : vector<8x1xf32>
    %61 = vector.broadcast %60 : vector<8x1xf32> to vector<8x32xf32>
    %62 = arith.mulf %57, %61 : vector<8x32xf32>
    %63 = vector.broadcast %41 : vector<1x32xf32> to vector<8x32xf32>
    %64 = arith.mulf %62, %63 : vector<8x32xf32>
    %65 = vector.broadcast %42 : vector<1x32xf32> to vector<8x32xf32>
    %66 = arith.addf %64, %65 : vector<8x32xf32>
    %cst_31 = arith.constant 0.000000e+00 : f32
    %67 = vector.broadcast %cst_31 : f32 to vector<8x32xf32>
    %68 = arith.maximumf %66, %67 : vector<8x32xf32>
    %69 = arith.truncf %68 : vector<8x32xf32> to vector<8x32xbf16>
    %c0_32 = arith.constant 0 : index
    %c0_33 = arith.constant 0 : index
    %70 = vector.load %arg10[%c0_32, %c0_33] : memref<32x128xbf16, #tpu.memory_space<vmem>>, vector<32x128xbf16>
    %cst_34 = arith.constant dense<0.000000e+00> : vector<8x128xf32>
    %71 = tpu.matmul %69, %70, %cst_34 {dimension_numbers = #tpu.dot_dimension_numbers<[1], [0], [0], [1], [0, 0, 1, 1], [], []>} : vector<8x32xbf16>, vector<32x128xbf16>, vector<8x128xf32> -> vector<8x128xf32>
    %c0_35 = arith.constant 0 : index
    %c0_36 = arith.constant 0 : index
    %72 = vector.load %arg11[%c0_35, %c0_36] : memref<1x128xf32, #tpu.memory_space<vmem>>, vector<1x128xf32>
    %73 = vector.broadcast %72 : vector<1x128xf32> to vector<8x128xf32>
    %74 = arith.addf %71, %73 : vector<8x128xf32>
    %75 = math.tanh %74 : vector<8x128xf32>
    %c0_37 = arith.constant 0 : index
    %c0_38 = arith.constant 0 : index
    %76 = vector.load %arg12[%c0_37, %c0_38] : memref<8x128xf32, #tpu.memory_space<vmem>>, vector<8x128xf32>
    tpu.vector_store %arg12[%c0_37, %c0_38], %75 {strides = array<i32>} : memref<8x128xf32, #tpu.memory_space<vmem>>, vector<8x128xf32>,
    return
  }
  func.func @transform_0(%arg0: i32) -> (i32, i32) {
    %c0_i32 = arith.constant 0 : i32
    %c0_i32_0 = arith.constant 0 : i32
    return %arg0, %c0_i32 : i32, i32
  }
  func.func @transform_1(%arg0: i32) -> (i32, i32) {
    %c0_i32 = arith.constant 0 : i32
    %c0_i32_0 = arith.constant 0 : i32
    %c0_i32_1 = arith.constant 0 : i32
    return %c0_i32, %c0_i32_0 : i32, i32
  }
  func.func @transform_2(%arg0: i32) -> (i32, i32) {
    %c0_i32 = arith.constant 0 : i32
    %c0_i32_0 = arith.constant 0 : i32
    %c0_i32_1 = arith.constant 0 : i32
    return %c0_i32, %c0_i32_0 : i32, i32
  }
  func.func @transform_3(%arg0: i32) -> (i32, i32) {
    %c0_i32 = arith.constant 0 : i32
    %c0_i32_0 = arith.constant 0 : i32
    %c0_i32_1 = arith.constant 0 : i32
    return %c0_i32, %c0_i32_0 : i32, i32
  }
  func.func @transform_4(%arg0: i32) -> (i32, i32) {
    %c0_i32 = arith.constant 0 : i32
    %c0_i32_0 = arith.constant 0 : i32
    %c0_i32_1 = arith.constant 0 : i32
    return %c0_i32, %c0_i32_0 : i32, i32
  }
  func.func @transform_5(%arg0: i32) -> (i32, i32) {
    %c0_i32 = arith.constant 0 : i32
    %c0_i32_0 = arith.constant 0 : i32
    %c0_i32_1 = arith.constant 0 : i32
    return %c0_i32, %c0_i32_0 : i32, i32
  }
  func.func @transform_6(%arg0: i32) -> (i32, i32) {
    %c0_i32 = arith.constant 0 : i32
    %c0_i32_0 = arith.constant 0 : i32
    %c0_i32_1 = arith.constant 0 : i32
    return %c0_i32, %c0_i32_0 : i32, i32
  }
  func.func @transform_7(%arg0: i32) -> (i32, i32) {
    %c0_i32 = arith.constant 0 : i32
    %c0_i32_0 = arith.constant 0 : i32
    %c0_i32_1 = arith.constant 0 : i32
    return %c0_i32, %c0_i32_0 : i32, i32
  }
  func.func @transform_8(%arg0: i32) -> (i32, i32) {
    %c0_i32 = arith.constant 0 : i32
    %c0_i32_0 = arith.constant 0 : i32
    %c0_i32_1 = arith.constant 0 : i32
    return %c0_i32, %c0_i32_0 : i32, i32
  }
  func.func @transform_9(%arg0: i32) -> (i32, i32) {
    %c0_i32 = arith.constant 0 : i32
    %c0_i32_0 = arith.constant 0 : i32
    %c0_i32_1 = arith.constant 0 : i32
    return %c0_i32, %c0_i32_0 : i32, i32
  }
  func.func @transform_10(%arg0: i32) -> (i32, i32) {
    %c0_i32 = arith.constant 0 : i32
    %c0_i32_0 = arith.constant 0 : i32
    %c0_i32_1 = arith.constant 0 : i32
    return %c0_i32, %c0_i32_0 : i32, i32
  }
  func.func @transform_11(%arg0: i32) -> (i32, i32) {
    %c0_i32 = arith.constant 0 : i32
    %c0_i32_0 = arith.constant 0 : i32
    return %arg0, %c0_i32 : i32, i32
  }
}

</mosaic_0001>

<bundles_post_ra>
// kernel: actor_forward.1
= control target key start
LH: loop header
LB: loop body
LE: loop exit
PB: predicated region body
PF: predicated region fallthrough
CT: control target
= control target key end

     0   :  { %v404_v0 = vmov 0.0   ;;  %vm405_vm0 = vmmov 0   ;;  %vm64_vm1 = vcmask 261120   ;;  %vm110_vm2 = vcmask 523264   ;;  %s535_s1 = inlined_call_operand.vmem [shape: bf16[32,64], index: 1, kind: input, shape index: {}]   ;;  %s536_s0 = inlined_call_operand.vmem [shape: f32[8,32], index: 0, kind: input, shape index: {}]   ;;  %s537_s2 = inlined_call_operand.vmem [shape: f32[1,64], index: 2, kind: input, shape index: {}]   ;;  %s538_s5 = inlined_call_operand.vmem [shape: bf16[64,32], index: 5, kind: input, shape index: {}]   ;;  %s539_s3 = inlined_call_operand.vmem [shape: f32[1,64], index: 3, kind: input, shape index: {}]   ;;  %s540_s4 = inlined_call_operand.vmem [shape: f32[1,64], index: 4, kind: input, shape index: {}]   ;;  %s541_s6 = inlined_call_operand.vmem [shape: f32[1,32], index: 6, kind: input, shape index: {}]   ;;  %s542_s9 = inlined_call_operand.vmem [shape: bf16[32,128], index: 9, kind: input, shape index: {}]   ;;  %s543_s7 = inlined_call_operand.vmem [shape: f32[1,32], index: 7, kind: input, shape index: {}]   ;;  %s544_s8 = inlined_call_operand.vmem [shape: f32[1,32], index: 8, kind: input, shape index: {}]   ;;  %s545_s10 = inlined_call_operand.vmem [shape: f32[1,128], index: 10, kind: input, shape index: {}]   ;;  %s546_s11 = inlined_call_operand.vmem [shape: f32[8,128], index: 11, kind: output, shape index: {}]  }
   0x1   :  { %360 = vmatprep.subr.bf16.mxu0 %v404_v0  ;;  %v390_v1 = vld [vmem:[%s535_s1 + $0x8] sm:$0xff]   ;;  %364 = vmatprep.mubr.msk.bf16.mxu0 %vm405_vm0, %v404_v0  ;;  %v391_v2 = vld [vmem:[%s535_s1] sm:$0xff]   ;;  %v392_v14 = vld [vmem:[%s538_s5 + $0x18] sm:$0xff]  }
   0x2   :  { %368 = vmatprep.subr.bf16.mxu1 %v404_v0  ;;  %376 = vmatprep.mubr.msk.bf16.mxu1 %vm405_vm0, %v404_v0  ;;  %v39_v3 = vld [vmem:[%s536_s0] sm:$0xff]  ;;  %v393_v15 = vld [vmem:[%s538_s5 + $0x10] sm:$0xff]   ;;  %v394_v16 = vld [vmem:[%s538_s5 + $0x8] sm:$0xff]  }
   0x3   :  { %361 = vmatpush3.bf16.msra.mxu0 %v390_v1  ;;  %v40_v4 = vpack.c.bf16 %v39_v3, %v39_v3  ;;  %v331_v5 = vld [vmem:[%s537_s2] ss:$0 sm:$0xff]  ;;  %369 = vmatpush3.bf16.msra.mxu1 %v392_v14  ;;  %v396_v44 = vld [vmem:[%s542_s9 + $0x8] sm:$0xff]  }
   0x4   :  { %362 = vmatprep.subr.bf16.mxu0 %v404_v0  ;;  %370 = vmatprep.subr.bf16.mxu1 %v404_v0  ;;  %v395_v17 = vld [vmem:[%s538_s5] sm:$0xff]  }
   0x5   :  { %v335_v28 = vld [vmem:[%s539_s3] ss:$0 sm:$0xff] }
   0x6   :  { %v336_v30 = vld [vmem:[%s540_s4] ss:$0 sm:$0xff] }
   0x7   :  { %363 = vmatpush3.bf16.msra.mxu0 %v391_v2  ;;  %371 = vmatpush3.bf16.msra.mxu1 %v393_v15  ;;  %v337_v35 = vld [vmem:[%s541_s6] ss:$0 sm:$0xff] }
   0x8   :  { %380 = vmatprep.subr.bf16.mxu0 %v404_v0  ;;  %372 = vmatprep.subr.bf16.mxu1 %v404_v0  ;;  %v397_v45 = vld [vmem:[%s542_s9] sm:$0xff]  }
   0x9   :  { %v343_v56 = vld [vmem:[%s543_s7] ss:$0 sm:$0xff] }
   0xa   :  { %365 = vmatmul.mubr.msk.bf16.vlgmr.msra.gmra.mxu0 %vm64_vm1, %v40_v4  ;;  %v344_v58 = vld [vmem:[%s544_s8] ss:$0 sm:$0xff] }
   0xb   :  { %384 = vmatprep.mubr.msk.bf16.mxu0 %vm405_vm0, %v404_v0  ;;  %373 = vmatpush3.bf16.msra.mxu1 %v394_v16  ;;  %v345_v63 = vld [vmem:[%s545_s10] ss:$0 sm:$0xff] }
   0xc   :  { %374 = vmatprep.subr.bf16.mxu1 %v404_v0  ;;  %381 = vmatpush3.bf16.msra.mxu0 %v396_v44 }
   0xd   :  { %382 = vmatprep.subr.bf16.mxu0 %v404_v0 }
   0xf   :  { %375 = vmatpush3.bf16.msra.mxu1 %v395_v17 }
  0x10   :  { %383 = vmatpush3.bf16.msra.mxu0 %v397_v45 }
  0xca   :  { %v102_v6 = vpop.f32.mrf.mxu0 }
  0xcb   :  { %v103_v7 = vadd.f32 %v331_v5, %v102_v6 }
  0xcc   :  { %v366_v8 = vpop.f32.mrf.mxu0 }
  0xcd   :  { %v111_v9 = vsel %vm110_vm2, %v103_v7, 0.0  ;;  %v114_v10 = vmul.f32 %v103_v7, %v103_v7 }
  0xce   :  { %112 = vadd.xlane.f32.xlu0 %v111_v9  ;;  %v105_v11 = vpop.f32.mrf.mxu0 }
  0xcf   :  { %v115_v13 = vsel %vm110_vm2, %v114_v10, 0.0 }
  0xd0   :  { %v367_v12 = vpop.f32.mrf.mxu0 }
  0xd2   :  { %116 = vadd.xlane.f32.xlu0 %v115_v13 }
 0x157   :  { %v113_v18 = vpop.xlane.xlu0 %112 }
 0x158   :  { %v118_v19 = vmul.f32 0.015625, %v113_v18 }
 0x15a   :  { %v120_v21 = vmul.f32 %v118_v19, %v118_v19  ;;  %v123_v26 = vsub.f32 %v103_v7, %v118_v19 }
 0x15b   :  { %v117_v20 = vpop.xlane.xlu0 %116 }
 0x15c   :  { %v119_v22 = vmul.f32 0.015625, %v117_v20 }
 0x15e   :  { %v121_v23 = vsub.f32 %v119_v22, %v120_v21 }
 0x160   :  { %v122_v24 = vmax.f32 %v121_v23, 0.0 }
 0x162   :  { %v124_v25 = vadd.f32 1e-05, %v122_v24 }
 0x164   :  { %398 = vrsqrt.f32 %v124_v25 }
 0x171   :  { %v399_v27 = vpop.eup %398 }
 0x172   :  { %v126_v29 = vmul.f32 %v399_v27, %v123_v26 }
 0x174   :  { %v133_v31 = vmul.f32 %v335_v28, %v126_v29 }
 0x176   :  { %v140_v32 = vadd.f32 %v336_v30, %v133_v31 }
 0x178   :  { %v141_v33 = vmax.f32 %v140_v32, 0.0 }
 0x17a   :  { %v142_v34 = vpack.c.bf16 %v141_v33, %v141_v33 }
 0x17c   :  { %377 = vmatmul.mubr.msk.bf16.vlgmr.msra.gmra.mxu1 %vm110_vm2, %v142_v34 }
 0x23c   :  { %v219_v36 = vpop.f32.mrf.mxu1 }
 0x23d   :  { %v220_v37 = vadd.f32 %v337_v35, %v219_v36 }
 0x23e   :  { %v378_v38 = vpop.f32.mrf.mxu1 }
 0x23f   :  { %v227_v39 = vsel %vm64_vm1, %v220_v37, 0.0  ;;  %v230_v40 = vmul.f32 %v220_v37, %v220_v37 }
 0x240   :  { %228 = vadd.xlane.f32.xlu1 %v227_v39  ;;  %v222_v41 = vpop.f32.mrf.mxu1 }
 0x241   :  { %v231_v43 = vsel %vm64_vm1, %v230_v40, 0.0 }
 0x242   :  { %v379_v42 = vpop.f32.mrf.mxu1 }
 0x244   :  { %232 = vadd.xlane.f32.xlu1 %v231_v43 }
 0x2c9   :  { %v229_v46 = vpop.xlane.xlu1 %228 }
 0x2ca   :  { %v234_v47 = vmul.f32 0.03125, %v229_v46 }
 0x2cc   :  { %v236_v49 = vmul.f32 %v234_v47, %v234_v47  ;;  %v239_v54 = vsub.f32 %v220_v37, %v234_v47 }
 0x2cd   :  { %v233_v48 = vpop.xlane.xlu1 %232 }
 0x2ce   :  { %v235_v50 = vmul.f32 0.03125, %v233_v48 }
 0x2d0   :  { %v237_v51 = vsub.f32 %v235_v50, %v236_v49 }
 0x2d2   :  { %v238_v52 = vmax.f32 %v237_v51, 0.0 }
 0x2d4   :  { %v240_v53 = vadd.f32 1e-05, %v238_v52 }
 0x2d6   :  { %400 = vrsqrt.f32 %v240_v53 }
 0x2e3   :  { %v401_v55 = vpop.eup %400 }
 0x2e4   :  { %v242_v57 = vmul.f32 %v401_v55, %v239_v54 }
 0x2e6   :  { %v249_v59 = vmul.f32 %v343_v56, %v242_v57 }
 0x2e8   :  { %v256_v60 = vadd.f32 %v344_v58, %v249_v59 }
 0x2ea   :  { %v257_v61 = vmax.f32 %v256_v60, 0.0 }
 0x2ec   :  { %v258_v62 = vpack.c.bf16 %v257_v61, %v257_v61 }
 0x2ee   :  { %385 = vmatmul.mubr.msk.bf16.vlgmr.msra.gmra.mxu0 %vm64_vm1, %v258_v62 }
 0x3ae   :  { %v319_v0 = vpop.f32.mrf.mxu0 }
 0x3af   :  { %v320_v1 = vadd.f32 %v345_v63, %v319_v0 }
 0x3b0   :  { %v386_v2 = vpop.f32.mrf.mxu0 }
 0x3b1   :  { %402 = vtanh.f32 %v320_v1 }
 0x3b2   :  { %v322_v3 = vpop.f32.mrf.mxu0 }
 0x3b4   :  { %v387_v4 = vpop.f32.mrf.mxu0 }
 0x3be   :  { %v403_v5 = vpop.eup %402 }
 0x3bf   :  { %326 = vst [vmem:[%s546_s11] sm:$0xff] %v403_v5 }

</bundles_post_ra>
